<compile_context>
chip_gen: v6e
topology: v6e:2x2x1
jax: 0.10.0
libtpu: 0.0.40
codegen_flags: <defaults>
</compile_context>

<pallas_src>
import jax
import jax.numpy as jnp
import numpy as np
from jax.experimental import pallas as pl
from jax.experimental.pallas import tpu as pltpu


def _make_ge_net_kernel(num_hidden_layers: int, ytype: str, compute_dtype):
    """Fused feature-major GE_Net forward kernel.

    Kernel ref order:
      x   (F_total, tile_b)              fused [x1|x2|x3]^T activation tile
      W0  (H0, F_total), b0 (H0, 1)      layer 0 (sparse scales pre-folded)
      (Wi (Hi, Hi-1), bi (Hi, 1))        for i in 1..num_hidden_layers-1
      w_last (H_last, 1)                 final no-bias Linear, as a column
      out (1, tile_b)
    """

    def kernel(x_ref, *refs):
        out_ref = refs[-1]
        params = refs[:-1]

        x = x_ref[...].astype(compute_dtype)                  # (F, tile_b)

        # Layer 0: one MXU matmul (concat + sparse scales already folded in).
        W0, b0 = params[0], params[1]
        h = jnp.dot(W0[...], x, preferred_element_type=jnp.float32) + b0[...]
        h = jnp.maximum(h, 0.0)                                # (H0, tile_b) f32

        idx = 2
        for _ in range(1, num_hidden_layers):
            W, b = params[idx], params[idx + 1]
            idx += 2
            h = jnp.dot(W[...], h.astype(compute_dtype),
                        preferred_element_type=jnp.float32) + b[...]
            h = jnp.maximum(h, 0.0)

        # Final no-bias Linear to 1 output: VPU multiply + sublane reduce,
        # producing a lane-dense (1, tile_b) row; sigmoid runs on full vregs.
        w_last = params[idx]                                   # (H_last, 1) f32
        pred = jnp.sum(h * w_last[...], axis=0, keepdims=True)  # (1, tile_b)
        if ytype == "Binary":
            pred = 1.0 / (1.0 + jnp.exp(-pred))                # sigmoid, f32
        out_ref[...] = pred.astype(out_ref.dtype)

    return kernel


def init_ge_net_params(key, In_Nodes, Interaction_Nodes, Clinical_Nodes,
                       num_hidden_layers, nodes_hidden_layer):
    """Deterministic parameter init mirroring GE_Net.__init__ (isfunc=False)."""
    # TODO(synk): isfunc=True init (Weight_Sparse1/2 from a fitted sklearn
    # model_reg.coef_) needs external data; forward semantics are identical.
    keys = jax.random.split(key, 3 + 2 * num_hidden_layers)
    ki = iter(range(len(keys)))

    # Weight_Sparse: uniform(0, 1)
    w1 = jax.random.uniform(keys[next(ki)], (In_Nodes,), jnp.float32, 0.0, 1.0)
    w2 = jax.random.uniform(keys[next(ki)], (Interaction_Nodes,), jnp.float32,
                            0.0, 1.0)

    hidden = []
    in_dim = In_Nodes + Interaction_Nodes + Clinical_Nodes
    dims = [in_dim] + list(nodes_hidden_layer)
    for i in range(num_hidden_layers):
        bound = 1.0 / np.sqrt(dims[i])        # PyTorch nn.Linear default init
        W = jax.random.uniform(keys[next(ki)], (dims[i], dims[i + 1]),
                               jnp.float32, -bound, bound)
        b = jax.random.uniform(keys[next(ki)], (dims[i + 1],),
                               jnp.float32, -bound, bound)
        hidden.append((W, b))

    # Final layer: uniform(-0.001, 0.001), no bias.
    W_last = jax.random.uniform(keys[next(ki)], (dims[-1], 1),
                                jnp.float32, -0.001, 0.001)

    return {"w1": w1, "w2": w2, "hidden": hidden, "W_last": W_last}


def prepare_ge_net_params(params, use_bf16=True):
    """One-time prep: fold the sparse scales into the layer-0 weight columns
    (f32, before any bf16 cast), transpose all weights to feature-major
    (out, in), and cast matmul weights to the compute dtype.  Biases and the
    final weight column stay f32."""
    compute_dtype = jnp.bfloat16 if use_bf16 else jnp.float32
    In = params["w1"].shape[0]
    Inter = params["w2"].shape[0]

    W0, b0 = params["hidden"][0]                      # (F_total, H0), (H0,)
    Clin = W0.shape[0] - In - Inter
    scale = jnp.concatenate([params["w1"], params["w2"],
                             jnp.ones((Clin,), jnp.float32)])
    flat = [(W0 * scale[:, None]).T.astype(compute_dtype),   # (H0, F_total)
            b0.reshape(-1, 1).astype(jnp.float32)]
    for (W, b) in params["hidden"][1:]:
        flat.append(W.T.astype(compute_dtype))               # (Hi, Hi-1)
        flat.append(b.reshape(-1, 1).astype(jnp.float32))
    flat.append(params["W_last"].reshape(-1, 1).astype(jnp.float32))  # (H,1)

    return {"flat": flat,
            "num_hidden_layers": len(params["hidden"]),
            "compute_dtype": compute_dtype}


def ge_net_forward(x1, x2, x3, prepped, ytype, *, tile_b=16384):
    """Pallas wrapper: feature-major, batch-in-lanes, weight-resident forward."""
    compute_dtype = prepped["compute_dtype"]
    num_hidden_layers = prepped["num_hidden_layers"]
    flat = prepped["flat"]

    B = x1.shape[0]
    # Single wrapper pass: fused feature-major input (F_total, B).  No dtype
    # cast (done in-kernel) and no batch padding (ragged last block).
    x = jnp.concatenate([x1.T, x2.T, x3.T], axis=0)
    F_total = x.shape[0]

    if B <= 128:
        tile_b = B                                # one full-width block
    else:
        tile_b = max(128, (min(tile_b, B) // 128) * 128)
        # Cap so grid >= 2 when possible: v7x has 2 TensorCores per chip.
        half = 128 * pl.cdiv(pl.cdiv(B, 2), 128)
        tile_b = min(tile_b, half)
    grid = (pl.cdiv(B, tile_b),)

    kernel = _make_ge_net_kernel(num_hidden_layers, ytype, compute_dtype)

    in_specs = [pl.BlockSpec((F_total, tile_b), lambda i: (0, i))]
    # Constant index_map -> each weight/bias is DMA'd once and stays
    # VMEM-resident across all batch tiles.
    in_specs += [pl.BlockSpec(p.shape, lambda i: (0, 0)) for p in flat]
    out_spec = pl.BlockSpec((1, tile_b), lambda i: (0, i))

    # Advisory cost estimate for XLA's scheduler.
    dims = [flat[0].shape[1], flat[0].shape[0]]
    j = 2
    for _ in range(1, num_hidden_layers):
        dims.append(flat[j].shape[0])
        j += 2
    flops = 2 * B * sum(dims[k] * dims[k + 1] for k in range(len(dims) - 1))
    flops += 2 * B * dims[-1]                     # final dot-product column
    act_bytes = jnp.dtype(x.dtype).itemsize
    weight_bytes = sum(int(np.prod(p.shape)) * jnp.dtype(p.dtype).itemsize
                       for p in flat)
    cost = pl.CostEstimate(
        flops=int(flops),
        transcendentals=int(B) if ytype == "Binary" else 0,
        bytes_accessed=int(B * F_total * act_bytes + B * 4 + weight_bytes))

    out = pl.pallas_call(
        kernel,
        out_shape=jax.ShapeDtypeStruct((1, B), jnp.float32),
        grid=grid,
        in_specs=in_specs,
        out_specs=out_spec,
        compiler_params=pltpu.CompilerParams(
            dimension_semantics=("parallel",),    # megacore sharding on v7x
            vmem_limit_bytes=32 * 1024 * 1024),   # >> ~10 MiB real footprint
        cost_estimate=cost,
    )(x, *flat)

    # (1, B) lane-dense row -> (B, 1) as the torch module returns.
    return out.reshape(B, 1)


def ge_net_reference(x1, x2, x3, params, ytype, use_bf16=True):
    """Pure-JAX reference with matched precision (bf16 matmul operands when
    use_bf16, f32 accumulation / elementwise), mirroring GE_Net.forward."""
    cd = jnp.bfloat16 if use_bf16 else jnp.float32
    In = params["w1"].shape[0]
    Inter = params["w2"].shape[0]
    W0, b0 = params["hidden"][0]
    scale = jnp.concatenate([params["w1"], params["w2"],
                             jnp.ones((W0.shape[0] - In - Inter,), jnp.float32)])
    W0f = (W0 * scale[:, None]).astype(cd)
    x = jnp.concatenate([x1, x2, x3], axis=1).astype(cd)
    h = jnp.maximum(
        jnp.dot(x, W0f, preferred_element_type=jnp.float32) + b0, 0.0)
    for (W, b) in params["hidden"][1:]:
        h = jnp.maximum(
            jnp.dot(h.astype(cd), W.astype(cd),
                    preferred_element_type=jnp.float32) + b, 0.0)
    pred = jnp.sum(h * params["W_last"].reshape(1, -1), axis=-1, keepdims=True)
    if ytype == "Binary":
        pred = 1.0 / (1.0 + jnp.exp(-pred))
    return pred


if __name__ == "__main__":
    # Small synthetic configuration (consistent with the module).
    In_Nodes = 8
    Interaction_Nodes = 16
    Clinical_Nodes = 4
    num_hidden_layers = 2
    nodes_hidden_layer = [32, 16]
    ytype = "Binary"

    key = jax.random.PRNGKey(0)
    kp, k1, k2, k3 = jax.random.split(key, 4)
    params = init_ge_net_params(kp, In_Nodes, Interaction_Nodes, Clinical_Nodes,
                                num_hidden_layers, nodes_hidden_layer)

    # --- Check 1: tiny batch (single block), exact f32 path. ---
    batch = 2
    x1 = jax.random.normal(k1, (batch, In_Nodes), jnp.float32)
    x2 = jax.random.normal(k2, (batch, Interaction_Nodes), jnp.float32)
    x3 = jax.random.normal(k3, (batch, Clinical_Nodes), jnp.float32)

    prepped_f32 = prepare_ge_net_params(params, use_bf16=False)
    out_f32 = jax.block_until_ready(
        ge_net_forward(x1, x2, x3, prepped_f32, ytype))
    ref_f32 = ge_net_reference(x1, x2, x3, params, ytype, use_bf16=False)
    np.testing.assert_allclose(np.asarray(out_f32), np.asarray(ref_f32),
                               rtol=1e-5, atol=1e-5)

    # --- Check 2: multi-tile grid with a ragged last block, bf16 streaming. ---
    batch2 = 300
    kb1, kb2, kb3 = jax.random.split(jax.random.PRNGKey(1), 3)
    y1 = jax.random.normal(kb1, (batch2, In_Nodes), jnp.float32)
    y2 = jax.random.normal(kb2, (batch2, Interaction_Nodes), jnp.float32)
    y3 = jax.random.normal(kb3, (batch2, Clinical_Nodes), jnp.float32)

    prepped_bf16 = prepare_ge_net_params(params, use_bf16=True)
    out_bf16 = jax.block_until_ready(
        ge_net_forward(y1, y2, y3, prepped_bf16, ytype, tile_b=128))
    ref_bf16 = ge_net_reference(y1, y2, y3, params, ytype, use_bf16=True)
    np.testing.assert_allclose(np.asarray(out_bf16), np.asarray(ref_bf16),
                               rtol=1e-4, atol=1e-4)

    print("KERNEL_OK")
</pallas_src>

<mosaic_0001>
module attributes {stable_mosaic.version = 11 : i64} {
  func.func @kernel(%arg0: i32, %arg1: memref<28x2xf32, #tpu.memory_space<vmem>>, %arg2: memref<32x28xf32, #tpu.memory_space<vmem>>, %arg3: memref<32x1xf32, #tpu.memory_space<vmem>>, %arg4: memref<16x32xf32, #tpu.memory_space<vmem>>, %arg5: memref<16x1xf32, #tpu.memory_space<vmem>>, %arg6: memref<16x1xf32, #tpu.memory_space<vmem>>, %arg7: memref<1x2xf32, #tpu.memory_space<vmem>>) attributes {dimension_semantics = [#tpu.dimension_semantics<parallel>], iteration_bounds = array<i64: 1>, scalar_prefetch = 0 : i64, scratch_operands = 0 : i64, tpu.core_type = #tpu.core_type<tc>, window_params = [{transform_indices = @transform_0, window_bounds = array<i64: 28, 2>}, {pipeline_mode = #tpu.pipeline_mode<synchronous>, transform_indices = @transform_1, window_bounds = array<i64: 32, 28>}, {pipeline_mode = #tpu.pipeline_mode<synchronous>, transform_indices = @transform_2, window_bounds = array<i64: 32, 1>}, {pipeline_mode = #tpu.pipeline_mode<synchronous>, transform_indices = @transform_3, window_bounds = array<i64: 16, 32>}, {pipeline_mode = #tpu.pipeline_mode<synchronous>, transform_indices = @transform_4, window_bounds = array<i64: 16, 1>}, {pipeline_mode = #tpu.pipeline_mode<synchronous>, transform_indices = @transform_5, window_bounds = array<i64: 16, 1>}, {transform_indices = @transform_6, window_bounds = array<i64: 1, 2>}]} {
    %c0 = arith.constant 0 : index
    %c0_0 = arith.constant 0 : index
    %0 = vector.load %arg1[%c0, %c0_0] : memref<28x2xf32, #tpu.memory_space<vmem>>, vector<28x2xf32>
    %c0_1 = arith.constant 0 : index
    %c0_2 = arith.constant 0 : index
    %1 = vector.load %arg2[%c0_1, %c0_2] : memref<32x28xf32, #tpu.memory_space<vmem>>, vector<32x28xf32>
    %cst = arith.constant dense<0.000000e+00> : vector<32x2xf32>
    %2 = tpu.matmul %1, %0, %cst {dimension_numbers = #tpu.dot_dimension_numbers<[1], [0], [0], [1], [0, 0, 1, 1], [], []>} : vector<32x28xf32>, vector<28x2xf32>, vector<32x2xf32> -> vector<32x2xf32>
    %c0_3 = arith.constant 0 : index
    %c0_4 = arith.constant 0 : index
    %3 = vector.load %arg3[%c0_3, %c0_4] : memref<32x1xf32, #tpu.memory_space<vmem>>, vector<32x1xf32>
    %4 = vector.broadcast %3 : vector<32x1xf32> to vector<32x2xf32>
    %5 = arith.addf %2, %4 : vector<32x2xf32>
    %cst_5 = arith.constant 0.000000e+00 : f32
    %6 = vector.broadcast %cst_5 : f32 to vector<32x2xf32>
    %7 = arith.maximumf %5, %6 : vector<32x2xf32>
    %c0_6 = arith.constant 0 : index
    %c0_7 = arith.constant 0 : index
    %8 = vector.load %arg4[%c0_6, %c0_7] : memref<16x32xf32, #tpu.memory_space<vmem>>, vector<16x32xf32>
    %cst_8 = arith.constant dense<0.000000e+00> : vector<16x2xf32>
    %9 = tpu.matmul %8, %7, %cst_8 {dimension_numbers = #tpu.dot_dimension_numbers<[1], [0], [0], [1], [0, 0, 1, 1], [], []>} : vector<16x32xf32>, vector<32x2xf32>, vector<16x2xf32> -> vector<16x2xf32>
    %c0_9 = arith.constant 0 : index
    %c0_10 = arith.constant 0 : index
    %10 = vector.load %arg5[%c0_9, %c0_10] : memref<16x1xf32, #tpu.memory_space<vmem>>, vector<16x1xf32>
    %11 = vector.broadcast %10 : vector<16x1xf32> to vector<16x2xf32>
    %12 = arith.addf %9, %11 : vector<16x2xf32>
    %cst_11 = arith.constant 0.000000e+00 : f32
    %13 = vector.broadcast %cst_11 : f32 to vector<16x2xf32>
    %14 = arith.maximumf %12, %13 : vector<16x2xf32>
    %c0_12 = arith.constant 0 : index
    %c0_13 = arith.constant 0 : index
    %15 = vector.load %arg6[%c0_12, %c0_13] : memref<16x1xf32, #tpu.memory_space<vmem>>, vector<16x1xf32>
    %16 = vector.broadcast %15 : vector<16x1xf32> to vector<16x2xf32>
    %17 = arith.mulf %14, %16 : vector<16x2xf32>
    %cst_14 = arith.constant dense<0.000000e+00> : vector<2xf32>
    %18 = vector.multi_reduction <add>, %17, %cst_14 [0] : vector<16x2xf32> to vector<2xf32>
    %19 = vector.shape_cast %18 : vector<2xf32> to vector<1x2xf32>
    %cst_15 = arith.constant 0.000000e+00 : f32
    %20 = vector.broadcast %cst_15 : f32 to vector<1x2xf32>
    %21 = arith.subf %20, %19 : vector<1x2xf32>
    %22 = math.exp %21 : vector<1x2xf32>
    %cst_16 = arith.constant 1.000000e+00 : f32
    %23 = vector.broadcast %cst_16 : f32 to vector<1x2xf32>
    %24 = arith.addf %23, %22 : vector<1x2xf32>
    %cst_17 = arith.constant 1.000000e+00 : f32
    %25 = vector.broadcast %cst_17 : f32 to vector<1x2xf32>
    %26 = arith.divf %25, %24 : vector<1x2xf32>
    %c0_18 = arith.constant 0 : index
    %c0_19 = arith.constant 0 : index
    %27 = vector.load %arg7[%c0_18, %c0_19] : memref<1x2xf32, #tpu.memory_space<vmem>>, vector<1x2xf32>
    tpu.vector_store %arg7[%c0_18, %c0_19], %26 {strides = array<i32>} : memref<1x2xf32, #tpu.memory_space<vmem>>, vector<1x2xf32>,
    return
  }
  func.func @transform_0(%arg0: i32) -> (i32, i32) {
    %c0_i32 = arith.constant 0 : i32
    %c0_i32_0 = arith.constant 0 : i32
    return %c0_i32, %arg0 : i32, i32
  }
  func.func @transform_1(%arg0: i32) -> (i32, i32) {
    %c0_i32 = arith.constant 0 : i32
    %c0_i32_0 = arith.constant 0 : i32
    %c0_i32_1 = arith.constant 0 : i32
    return %c0_i32, %c0_i32_0 : i32, i32
  }
  func.func @transform_2(%arg0: i32) -> (i32, i32) {
    %c0_i32 = arith.constant 0 : i32
    %c0_i32_0 = arith.constant 0 : i32
    %c0_i32_1 = arith.constant 0 : i32
    return %c0_i32, %c0_i32_0 : i32, i32
  }
  func.func @transform_3(%arg0: i32) -> (i32, i32) {
    %c0_i32 = arith.constant 0 : i32
    %c0_i32_0 = arith.constant 0 : i32
    %c0_i32_1 = arith.constant 0 : i32
    return %c0_i32, %c0_i32_0 : i32, i32
  }
  func.func @transform_4(%arg0: i32) -> (i32, i32) {
    %c0_i32 = arith.constant 0 : i32
    %c0_i32_0 = arith.constant 0 : i32
    %c0_i32_1 = arith.constant 0 : i32
    return %c0_i32, %c0_i32_0 : i32, i32
  }
  func.func @transform_5(%arg0: i32) -> (i32, i32) {
    %c0_i32 = arith.constant 0 : i32
    %c0_i32_0 = arith.constant 0 : i32
    %c0_i32_1 = arith.constant 0 : i32
    return %c0_i32, %c0_i32_0 : i32, i32
  }
  func.func @transform_6(%arg0: i32) -> (i32, i32) {
    %c0_i32 = arith.constant 0 : i32
    %c0_i32_0 = arith.constant 0 : i32
    return %c0_i32, %arg0 : i32, i32
  }
}

</mosaic_0001>

<bundles_post_ra>
// kernel: tpu_custom_call.1
= control target key start
LH: loop header
LB: loop body
LE: loop exit
PB: predicated region body
PF: predicated region fallthrough
CT: control target
= control target key end

     0   :  { %vm69_vm0 = vcmask 1043456   ;;  %vm56_vm1 = vcmask 228352   ;;  %v382_v5 = vmov 0   ;;  %s482_s0 = inlined_call_operand.vmem [shape: f32[28,2], index: 0, kind: input, shape index: {}]   ;;  %s483_s1 = inlined_call_operand.vmem [shape: f32[32,28], index: 1, kind: input, shape index: {}]   ;;  %s484_s2 = inlined_call_operand.vmem [shape: f32[32,1], index: 2, kind: input, shape index: {}]   ;;  %s485_s3 = inlined_call_operand.vmem [shape: f32[16,32], index: 3, kind: input, shape index: {}]   ;;  %s486_s4 = inlined_call_operand.vmem [shape: f32[16,1], index: 4, kind: input, shape index: {}]   ;;  %s487_s5 = inlined_call_operand.vmem [shape: f32[16,1], index: 5, kind: input, shape index: {}]   ;;  %s488_s6 = inlined_call_operand.hbm [shape: f32[1,2], index: 6, kind: output, shape index: {}]  }
   0x1   :  { %v27_v0 = vld [vmem:[%s482_s0 + $0x18] sm:$0xf]  ;;  %v26_v1 = vld [vmem:[%s482_s0 + $0x10] sm:$0xff]  ;;  %v28_v2 = vld [vmem:[%s483_s1] sm:$0xff]  ;;  %354 = vset.pattern.permute.xlu0 %v382_v5  ;;  %355 = vset.pattern.permute.xlu1 %v382_v5 }
   0x2   :  { %327 = vmatprep.subr.msk.mxu0 %vm69_vm0, %v27_v0  ;;  %v25_v3 = vld [vmem:[%s482_s0 + $0x8] sm:$0xff]  ;;  %335 = vmatprep.mubr.msk.f32.mxu0 %vm56_vm1, %v28_v2  ;;  %v35_v4 = vld [vmem:[%s484_s2 + $0x18] sm:$0xff]  ;;  %v24_v7 = vld [vmem:[%s482_s0] sm:$0xff] }
   0x3   :  { %328 = vmatpush3.msk.msra.mxu0 %vm69_vm0, %v27_v0  ;;  %v33_v6 = vld [vmem:[%s484_s2 + $0x8] sm:$0xff]  ;;  %53 = vperm.xlu0 %354, %v35_v4   ;;  %v34_v8 = vld [vmem:[%s484_s2 + $0x10] sm:$0xff] }
   0x4   :  { %329 = vmatprep.subr.mxu0 %v26_v1 }
   0x5   :  { %330 = vmatpush3.msra.mxu0 %v26_v1 }
   0x6   :  { %331 = vmatprep.subr.mxu0 %v25_v3 }
   0x7   :  { %11 = vsyncpa [#allocation3], 0  ;;  %332 = vmatpush3.msra.mxu0 %v25_v3  ;;  %v29_v9 = vld [vmem:[%s483_s1 + $0x8] sm:$0xff]  ;;  %43 = vperm.xlu1 %355, %v33_v6   ;;  %v30_v10 = vld [vmem:[%s483_s1 + $0x10] sm:$0xff]  ;;  %vm176_vm2 = vcmask 261120   ;;  %vm274_vm3 = vcmask 15360  }
   0x8   :  { %333 = vmatprep.subr.mxu0 %v24_v7  ;;  %v32_v11 = vld [vmem:[%s484_s2] sm:$0xff]  ;;  %48 = vperm.xlu0 %354, %v34_v8   ;;  %v31_v13 = vld [vmem:[%s483_s1 + $0x18] sm:$0xff]  ;;  %v165_v14 = vld [vmem:[%s486_s4 + $0x8] sm:$0xff]  ;;  %vm290_vm4 = vcmask 8192  }
   0x9   :  { %334 = vmatpush3.msra.mxu0 %v24_v7  ;;  %v164_v12 = vld [vmem:[%s486_s4] sm:$0xff]  ;;  %v261_v16 = vld [vmem:[%s487_s5 + $0x8] sm:$0xff] }
   0xa   :  { %336 = vmatmul.mubr.msk.f32.vlgmr.msra.gmra.mxu0 %vm56_vm1, %v29_v9  ;;  %v260_v15 = vld [vmem:[%s487_s5] sm:$0xff]  ;;  %v163_v34 = vld [vmem:[%s485_s3 + $0x8] sm:$0xff] }
   0xb   :  { %338 = vmatprep.mubr.msk.f32.mxu0 %vm56_vm1, %v30_v10  ;;  %38 = vperm.xlu1 %355, %v32_v11   ;;  %v162_v17 = vld [vmem:[%s485_s3] sm:$0xff]  ;;  %s383_s3 = smov [#allocation2]  }
   0xc   :  { %168 = vperm.xlu0 %354, %v164_v12   ;;  %349 = vmatprep.mubr.msk.f32.mxu1 %vm176_vm2, %v162_v17  ;;  %s298_s28 = sshll.u32 %s383_s3, 4  ;;  %s299_s28 = int_to_ptr.vmem [resolvable:$true] %s298_s28 }
   0xd   :  { %s360_s29 = scalar_lea.vmem %s299_s28, 16  ;;  %s364_s30 = scalar_lea.vmem %s299_s28, 32 }
   0xe   :  { %339 = vmatmul.mubr.msk.f32.gmra.mxu0 %vm56_vm1, %v31_v13  ;;  %p361_p0 = scmp.ne.s32.totalorder %s299_s28, %s360_s29  ;;  %p365_p1 = scmp.lt.s32.totalorder %s299_s28, %s299_s28 }
   0xf   :  { %173 = vperm.xlu1 %355, %v165_v14   ;;  %p366_p2 = scmp.lt.s32.totalorder %s364_s30, %s360_s29 }
  0x10   :  { %264 = vperm.xlu0 %354, %v260_v15  }
  0x11   :  { %p367_p3 = por %p366_p2, %p365_p1 }
  0x13   :  { %269 = vperm.xlu1 %355, %v261_v16   ;;  %p368_p4 = pnand %p367_p3, %p361_p0 }
  0x7e   :  { %v54_v18 = vpop.permute.xlu0 %53 }
  0x82   :  { %v44_v20 = vpop.permute.xlu1 %43 }
  0x83   :  { %v49_v24 = vpop.permute.xlu0 %48 }
  0x86   :  { %v39_v29 = vpop.permute.xlu1 %38 }
  0x87   :  { %v169_v36 = vpop.permute.xlu0 %168 }
  0x8a   :  { %v174_v35 = vpop.permute.xlu1 %173 }
  0x8b   :  { %v265_v45 = vpop.permute.xlu0 %264 }
  0x8e   :  { %v270_v42 = vpop.permute.xlu1 %269 }
  0xca   :  { %v337_v19 = vpop.f32.mrf.mxu0 }
  0xcb   :  { %v145_v26 = vadd.f32 %v337_v19, %v44_v20 }
  0xcc   :  { %v139_v21 = vpop.f32.mrf.mxu0 }
  0xcd   :  { %v140_v30 = vadd.f32 %v139_v21, %v39_v29  ;;  %v159_v32 = vmax.f32 %v145_v26, 0.0 }
  0xce   :  { %v340_v22 = vpop.f32.mrf.mxu0 }
  0xcf   :  { %v155_v23 = vadd.f32 %v340_v22, %v54_v18  ;;  %v158_v33 = vmax.f32 %v140_v30, 0.0 }
  0xd0   :  { %v149_v25 = vpop.f32.mrf.mxu0 }
  0xd1   :  { %v161_v27 = vmax.f32 %v155_v23, 0.0  ;;  %v150_v28 = vadd.f32 %v149_v25, %v49_v24 }
  0xd3   :  { %v160_v31 = vmax.f32 %v150_v28, 0.0  ;;  %341 = vmatprep.subr.mxu1 %v161_v27 }
  0xd4   :  { %342 = vmatpush3.msra.mxu1 %v161_v27 }
  0xd5   :  { %343 = vmatprep.subr.mxu1 %v160_v31 }
  0xd6   :  { %344 = vmatpush3.msra.mxu1 %v160_v31 }
  0xd7   :  { %345 = vmatprep.subr.mxu1 %v159_v32 }
  0xd8   :  { %346 = vmatpush3.msra.mxu1 %v159_v32 }
  0xd9   :  { %347 = vmatprep.subr.mxu1 %v158_v33 }
  0xda   :  { %348 = vmatpush3.msra.mxu1 %v158_v33 }
  0xdb   :  { %350 = vmatmul.mubr.msk.f32.vlgmr.msra.gmra.mxu1 %vm176_vm2, %v163_v34 }
 0x19b   :  { %v351_v37 = vpop.f32.mrf.mxu1 }
 0x19c   :  { %v255_v38 = vadd.f32 %v351_v37, %v174_v35 }
 0x19d   :  { %v249_v39 = vpop.f32.mrf.mxu1 }
 0x19e   :  { %v259_v40 = vmax.f32 %v255_v38, 0.0  ;;  %v250_v41 = vadd.f32 %v249_v39, %v169_v36 }
 0x1a0   :  { %v273_v43 = vmul.f32 %v270_v42, %v259_v40  ;;  %v258_v44 = vmax.f32 %v250_v41, 0.0 }
 0x1a2   :  { %v272_v46 = vmul.f32 %v265_v45, %v258_v44  ;;  %v276_v47 = vsel %vm274_vm3, %v273_v43, 0.0 }
 0x1a4   :  { %v275_v48 = vsel %vm274_vm3, %v272_v46, 0.0 }
 0x1a5   :  { %v277_v49 = vadd.f32 %v276_v47, %v275_v48 }
 0x1a7   :  { %v278_v50 = vrot.slane %v277_v49, 4 }
 0x1a9   :  { %v279_v51 = vadd.f32 %v278_v50, %v277_v49 }
 0x1ab   :  { %v280_v52 = vrot.slane %v279_v51, 2 }
 0x1ad   :  { %v281_v53 = vadd.f32 %v280_v52, %v279_v51 }
 0x1af   :  { %v282_v54 = vrot.slane %v281_v53, 1 }
 0x1b1   :  { %v283_v55 = vadd.f32 %v282_v54, %v281_v53 }
 0x1b3   :  { %v284_v56 = vsub.f32 0.0, %v283_v55 }
 0x1b5   :  { %v285_v57 = vmul.f32 1.442695, %v284_v56 }
 0x1b7   :  { %356 = vpow2.f32 %v285_v57 }
 0x1c4   :  { %v357_v58 = vpop.eup %356 }
 0x1c5   :  { %v287_v59 = vadd.f32 1.0, %v357_v58 }
 0x1c7   :  { %358 = vrcp.f32 %v287_v59 }
 0x1d4   :  { %v359_v60 = vpop.eup %358 }
 0x1d5   :  { %291 = vst.msk [vmem:[#allocation2] sm:$0x1] %vm290_vm4, %v359_v60 }
 0x1d6   :  { %371 = shalt.err (!%p368_p4)
}
 0x1d7   :  { %301 = dma.vmem_to_hbm [thread:$0]  %s299_s28, 16, %s488_s6, [#allocation3]  }
 0x1d8   :  { %380 = dma.done.wait [#allocation3], 16  }
 0x1d9   :  { %381 = vsyncadd [#allocation3], 4294967280 }
 0x1da   :  { %305 = vsyncpa [#allocation3], 1 }

</bundles_post_ra>
